<compile_context>
chip_gen: v6e
topology: v6e:2x2x1
jax: 0.10.0
libtpu: 0.0.40
codegen_flags: <defaults>
</compile_context>

<pallas_src>
import jax
import jax.numpy as jnp
from jax.experimental import pallas as pl
from jax.experimental.pallas import tpu as pltpu


# ----------------------------------------------------------------------------
# im2col for Conv2d(k=3, s=2, p=1) (wrapper side) — feature order (kh, kw, cin)
# ----------------------------------------------------------------------------
def im2col_3x3_s2(x_nhwc):
    N, H, W, Cin = x_nhwc.shape
    H2 = (H - 1) // 2 + 1          # matches PyTorch Conv2d(k=3, s=2, p=1)
    W2 = (W - 1) // 2 + 1
    xp = jnp.pad(x_nhwc, ((0, 0), (1, 1), (1, 1), (0, 0)))
    cols = [xp[:, dy:dy + 2 * H2:2, dx:dx + 2 * W2:2, :]
            for dy in range(3) for dx in range(3)]
    patches = jnp.concatenate(cols, axis=-1)              # (N, H2, W2, 9*Cin)
    return patches.reshape(N, H2 * W2, 9 * Cin), (N, H2, W2)


# ----------------------------------------------------------------------------
# One-time parameter prep (head fold, transposes, casts) — NOT in the per-call path
# ----------------------------------------------------------------------------
def prepare_params(params):
    w_eff = params["w_head"].astype(jnp.float32) @ params["w_cls"].astype(jnp.float32)
    b_eff = (params["b_head"].astype(jnp.float32) @ params["w_cls"].astype(jnp.float32)
             + params["b_cls"].astype(jnp.float32))
    C = params["w_stem"].shape[1]
    return {
        "w_stem_t": jnp.asarray(params["w_stem"]).T.astype(jnp.bfloat16),   # (C, K)
        "b_stem": params["b_stem"].astype(jnp.float32).reshape(C, 1),        # (C, 1)
        "w_eff": w_eff,                                                      # (C, NC)
        "b_eff": b_eff.reshape(1, -1),                                       # (1, NC)
    }


def _vmem_limit_bytes():
    """v7x has 64 MiB physical VMEM per TC; v5e/v6e have 128 MiB."""
    try:
        cap = getattr(pltpu.get_tpu_info(), "vmem_capacity_bytes", None)
    except Exception:
        cap = None
    if cap is None or cap <= 64 * 1024 * 1024:
        return 48 * 1024 * 1024
    return 100 * 1024 * 1024


def _pick_tile_hw(HW, tile_hw):
    if HW <= tile_hw:
        return HW                              # full-extent lane block; single tile
    t = (min(tile_hw, HW) // 128) * 128        # tiled lane dim must be a multiple of 128
    return max(t, 128)


# ----------------------------------------------------------------------------
# Fused stem-conv + SiLU + global-average-pool + folded-head Pallas kernel
# ----------------------------------------------------------------------------
def base_model2_forward(x_nchw, prep, *, tile_hw=4096):
    # bf16 before im2col so pad/slice/concat/transpose traffic is halved.
    x = jnp.transpose(x_nchw, (0, 2, 3, 1)).astype(jnp.bfloat16)   # NCHW -> NHWC
    patches, (N, H2, W2) = im2col_3x3_s2(x)                        # (N, HW, K) bf16
    patches_t = jnp.transpose(patches, (0, 2, 1))                  # (N, K, HW) lane-dense
    HW = H2 * W2
    K = patches_t.shape[1]
    C, NC = prep["w_eff"].shape

    t_hw = _pick_tile_hw(HW, int(tile_hw))
    n_tiles = pl.cdiv(HW, t_hw)
    needs_mask = (n_tiles * t_hw != HW)
    L = 128 if (t_hw >= 128 and t_hw % 128 == 0) else t_hw         # accumulator lane width
    n_chunks = t_hw // L
    inv_hw = 1.0 / float(HW)                                       # divide by TRUE HW

    def kernel(p_ref, w_ref, b_ref, we_ref, be_ref, o_ref, acc_ref):
        t = pl.program_id(1)

        @pl.when(t == 0)
        def _init():
            acc_ref[...] = jnp.zeros_like(acc_ref)

        # stem conv tile: (C,K)bf16 @ (K,t_hw)bf16 -> (C,t_hw) f32 on the MXU
        z = jnp.dot(w_ref[...], p_ref[0], preferred_element_type=jnp.float32)
        z = z + b_ref[...]                        # lane-broadcast bias (C,1)
        act = z * jax.nn.sigmoid(z)               # SiLU in f32 (v5e has no bf16 VPU/EUP)

        if needs_mask:
            # zero lanes past the true HW in the padded last tile (must stay BEFORE accumulate)
            cols = t * t_hw + jax.lax.broadcasted_iota(jnp.int32, (1, t_hw), 1)
            act = jnp.where(cols < HW, act, 0.0)

        # fused global-average-pool: VALU lane-fold to (C, L); cross-lane XLU reduce deferred
        part = act[:, 0:L]
        for i in range(1, n_chunks):
            part = part + act[:, i * L:(i + 1) * L]
        acc_ref[...] += part

        @pl.when(t == pl.num_programs(1) - 1)
        def _finalize():
            pooled = jnp.sum(acc_ref[...], axis=1, keepdims=True) * inv_hw      # (C, 1)
            # folded head: pooled^T @ w_eff via broadcast-mul + sublane reduce (NC is tiny)
            logits = jnp.sum(pooled * we_ref[...], axis=0, keepdims=True)       # (1, NC)
            o_ref[0] = (logits + be_ref[...]).astype(o_ref.dtype)

    flops = 2 * N * HW * K * C + 6 * N * HW * C + 2 * N * C * NC
    bytes_accessed = (patches_t.size * 2 + prep["w_stem_t"].size * 2
                      + 4 * (C + C * NC + NC + N * NC))

    out = pl.pallas_call(
        kernel,
        out_shape=jax.ShapeDtypeStruct((N, 1, NC), jnp.float32),
        grid=(N, n_tiles),
        in_specs=[
            pl.BlockSpec((1, K, t_hw), lambda n, t: (n, 0, t)),   # streamed, lane-dense patches
            pl.BlockSpec((C, K), lambda n, t: (0, 0)),            # grid-invariant weights
            pl.BlockSpec((C, 1), lambda n, t: (0, 0)),
            pl.BlockSpec((C, NC), lambda n, t: (0, 0)),
            pl.BlockSpec((1, NC), lambda n, t: (0, 0)),
        ],
        out_specs=pl.BlockSpec((1, 1, NC), lambda n, t: (n, 0, 0)),
        scratch_shapes=[pltpu.VMEM((C, L), jnp.float32)],         # pooled-sum accumulator
        compiler_params=pltpu.CompilerParams(
            dimension_semantics=("parallel", "arbitrary"),        # batch across TCs (v7x)
            vmem_limit_bytes=_vmem_limit_bytes(),
        ),
        cost_estimate=pl.CostEstimate(
            flops=flops,
            transcendentals=N * HW * C,
            bytes_accessed=bytes_accessed,
        ),
    )(patches_t, prep["w_stem_t"], prep["b_stem"], prep["w_eff"], prep["b_eff"])

    return out.reshape(N, NC)


# ----------------------------------------------------------------------------
# pure-JAX reference (same bf16 operand rounding as the kernel's MXU path, but
# with the UN-folded two-Linear head to check the fold is exact)
# ----------------------------------------------------------------------------
def reference_forward(x_nchw, params):
    x = jnp.transpose(x_nchw, (0, 2, 3, 1)).astype(jnp.float32)
    patches, _ = im2col_3x3_s2(x)
    p = patches.astype(jnp.bfloat16).astype(jnp.float32)
    w = params["w_stem"].astype(jnp.bfloat16).astype(jnp.float32)
    z = jnp.einsum("nqk,kc->nqc", p, w) + params["b_stem"]
    act = z * jax.nn.sigmoid(z)
    pooled = act.mean(axis=1)
    h = pooled @ params["w_head"] + params["b_head"]
    return h @ params["w_cls"] + params["b_cls"]


# ----------------------------------------------------------------------------
if __name__ == "__main__":
    key = jax.random.PRNGKey(0)
    k_x, k_x2, k_ws, k_bs, k_wh, k_bh, k_wc, k_bc = jax.random.split(key, 8)

    N, Cin, H, W = 2, 3, 16, 16          # small NCHW input (PyTorch convention)
    C_STEM = 32                          # stem output channels
    FEAT = 1000                          # efficientnet_b7 output dim
    NUM_CLASSES = 10

    params = {
        "w_stem": 0.1 * jax.random.normal(k_ws, (9 * Cin, C_STEM), jnp.float32),
        "b_stem": 0.1 * jax.random.normal(k_bs, (C_STEM,), jnp.float32),
        "w_head": 0.05 * jax.random.normal(k_wh, (C_STEM, FEAT), jnp.float32),
        "b_head": 0.05 * jax.random.normal(k_bh, (FEAT,), jnp.float32),
        "w_cls": 0.05 * jax.random.normal(k_wc, (FEAT, NUM_CLASSES), jnp.float32),
        "b_cls": 0.05 * jax.random.normal(k_bc, (NUM_CLASSES,), jnp.float32),
    }

    prep = prepare_params(params)        # head fold + casts done ONCE, outside the jit
    forward = jax.jit(base_model2_forward, static_argnames=("tile_hw",))

    # Case 1: 16x16 input -> HW = 64, single full-extent lane tile.
    x = jax.random.normal(k_x, (N, Cin, H, W), dtype=jnp.float32)
    out = jax.block_until_ready(forward(x, prep))
    ref = jax.block_until_ready(reference_forward(x, params))
    assert out.shape == (N, NUM_CLASSES), out.shape
    d1 = float(jnp.max(jnp.abs(out - ref)))
    assert jnp.allclose(out, ref, atol=1e-2, rtol=1e-2), f"mismatch vs reference: {d1}"

    # Case 2: 40x40 input with tile_hw=128 -> HW = 400, 4 pipelined HW tiles,
    # last tile padded/masked: exercises the multi-tile reduction + mask path.
    x2 = jax.random.normal(k_x2, (N, Cin, 40, 40), dtype=jnp.float32)
    out2 = jax.block_until_ready(forward(x2, prep, tile_hw=128))
    ref2 = jax.block_until_ready(reference_forward(x2, params))
    d2 = float(jnp.max(jnp.abs(out2 - ref2)))
    assert jnp.allclose(out2, ref2, atol=1e-2, rtol=1e-2), f"mismatch vs reference: {d2}"

    print("KERNEL_OK")
</pallas_src>

<mosaic_0001>
module attributes {stable_mosaic.version = 11 : i64} {
  func.func @kernel(%arg0: i32, %arg1: i32, %arg2: memref<1x27x64xbf16, #tpu.memory_space<vmem>>, %arg3: memref<32x27xbf16, #tpu.memory_space<vmem>>, %arg4: memref<32x1xf32, #tpu.memory_space<vmem>>, %arg5: memref<32x10xf32, #tpu.memory_space<vmem>>, %arg6: memref<1x10xf32, #tpu.memory_space<vmem>>, %arg7: memref<1x1x10xf32, #tpu.memory_space<vmem>>, %arg8: memref<32x64xf32, #tpu.memory_space<vmem>>) attributes {dimension_semantics = [#tpu.dimension_semantics<parallel>, #tpu.dimension_semantics<arbitrary>], iteration_bounds = array<i64: 2, 1>, scalar_prefetch = 0 : i64, scratch_operands = 1 : i64, tpu.core_type = #tpu.core_type<tc>, window_params = [{transform_indices = @transform_0, window_bounds = array<i64: 1, 27, 64>}, {pipeline_mode = #tpu.pipeline_mode<synchronous>, transform_indices = @transform_1, window_bounds = array<i64: 32, 27>}, {pipeline_mode = #tpu.pipeline_mode<synchronous>, transform_indices = @transform_2, window_bounds = array<i64: 32, 1>}, {pipeline_mode = #tpu.pipeline_mode<synchronous>, transform_indices = @transform_3, window_bounds = array<i64: 32, 10>}, {pipeline_mode = #tpu.pipeline_mode<synchronous>, transform_indices = @transform_4, window_bounds = array<i64: 1, 10>}, {transform_indices = @transform_5, window_bounds = array<i64: 1, 1, 10>}]} {
    %c0_i32 = arith.constant 0 : i32
    %0 = arith.cmpi eq, %arg1, %c0_i32 : i32
    %1 = arith.extui %0 : i1 to i32
    %c0_i32_0 = arith.constant 0 : i32
    %2 = arith.cmpi ne, %1, %c0_i32_0 : i32
    scf.if %2 {
      %cst_14 = arith.constant 0.000000e+00 : f32
      %22 = vector.broadcast %cst_14 : f32 to vector<32x64xf32>
      %c0_15 = arith.constant 0 : index
      %c0_16 = arith.constant 0 : index
      %23 = vector.load %arg8[%c0_15, %c0_16] : memref<32x64xf32, #tpu.memory_space<vmem>>, vector<32x64xf32>
      tpu.vector_store %arg8[%c0_15, %c0_16], %22 {strides = array<i32>} : memref<32x64xf32, #tpu.memory_space<vmem>>, vector<32x64xf32>,
    } else {
    }
    %c0 = arith.constant 0 : index
    %c0_1 = arith.constant 0 : index
    %3 = vector.load %arg3[%c0, %c0_1] : memref<32x27xbf16, #tpu.memory_space<vmem>>, vector<32x27xbf16>
    %c0_2 = arith.constant 0 : index
    %c0_3 = arith.constant 0 : index
    %c0_4 = arith.constant 0 : index
    %4 = vector.load %arg2[%c0_2, %c0_3, %c0_4] : memref<1x27x64xbf16, #tpu.memory_space<vmem>>, vector<1x27x64xbf16>
    %5 = vector.shape_cast %4 : vector<1x27x64xbf16> to vector<27x64xbf16>
    %cst = arith.constant dense<0.000000e+00> : vector<32x64xf32>
    %6 = tpu.matmul %3, %5, %cst {dimension_numbers = #tpu.dot_dimension_numbers<[1], [0], [0], [1], [0, 0, 1, 1], [], []>} : vector<32x27xbf16>, vector<27x64xbf16>, vector<32x64xf32> -> vector<32x64xf32>
    %c0_5 = arith.constant 0 : index
    %c0_6 = arith.constant 0 : index
    %7 = vector.load %arg4[%c0_5, %c0_6] : memref<32x1xf32, #tpu.memory_space<vmem>>, vector<32x1xf32>
    %8 = vector.broadcast %7 : vector<32x1xf32> to vector<32x64xf32>
    %9 = arith.addf %6, %8 : vector<32x64xf32>
    %10 = arith.negf %9 : vector<32x64xf32>
    %11 = math.exp %10 : vector<32x64xf32>
    %cst_7 = arith.constant 1.000000e+00 : f32
    %12 = vector.broadcast %cst_7 : f32 to vector<32x64xf32>
    %13 = arith.addf %12, %11 : vector<32x64xf32>
    %14 = arith.divf %12, %13 : vector<32x64xf32>
    %15 = arith.mulf %9, %14 : vector<32x64xf32>
    %c0_8 = arith.constant 0 : index
    %c0_9 = arith.constant 0 : index
    %16 = vector.load %arg8[%c0_8, %c0_9] : memref<32x64xf32, #tpu.memory_space<vmem>>, vector<32x64xf32>
    %17 = arith.addf %16, %15 : vector<32x64xf32>
    %c0_10 = arith.constant 0 : index
    %c0_11 = arith.constant 0 : index
    %18 = vector.load %arg8[%c0_10, %c0_11] : memref<32x64xf32, #tpu.memory_space<vmem>>, vector<32x64xf32>
    tpu.vector_store %arg8[%c0_10, %c0_11], %17 {strides = array<i32>} : memref<32x64xf32, #tpu.memory_space<vmem>>, vector<32x64xf32>,
    %c0_i32_12 = arith.constant 0 : i32
    %19 = arith.cmpi eq, %arg1, %c0_i32_12 : i32
    %20 = arith.extui %19 : i1 to i32
    %c0_i32_13 = arith.constant 0 : i32
    %21 = arith.cmpi ne, %20, %c0_i32_13 : i32
    scf.if %21 {
      %c0_14 = arith.constant 0 : index
      %c0_15 = arith.constant 0 : index
      %22 = vector.load %arg8[%c0_14, %c0_15] : memref<32x64xf32, #tpu.memory_space<vmem>>, vector<32x64xf32>
      %cst_16 = arith.constant dense<0.000000e+00> : vector<32xf32>
      %23 = vector.multi_reduction <add>, %22, %cst_16 [1] : vector<32x64xf32> to vector<32xf32>
      %24 = vector.shape_cast %23 : vector<32xf32> to vector<32x1xf32>
      %cst_17 = arith.constant 1.562500e-02 : f32
      %25 = vector.broadcast %cst_17 : f32 to vector<32x1xf32>
      %26 = arith.mulf %24, %25 : vector<32x1xf32>
      %c0_18 = arith.constant 0 : index
      %c0_19 = arith.constant 0 : index
      %27 = vector.load %arg5[%c0_18, %c0_19] : memref<32x10xf32, #tpu.memory_space<vmem>>, vector<32x10xf32>
      %28 = vector.broadcast %26 : vector<32x1xf32> to vector<32x10xf32>
      %29 = arith.mulf %28, %27 : vector<32x10xf32>
      %cst_20 = arith.constant dense<0.000000e+00> : vector<10xf32>
      %30 = vector.multi_reduction <add>, %29, %cst_20 [0] : vector<32x10xf32> to vector<10xf32>
      %31 = vector.shape_cast %30 : vector<10xf32> to vector<1x10xf32>
      %c0_21 = arith.constant 0 : index
      %c0_22 = arith.constant 0 : index
      %32 = vector.load %arg6[%c0_21, %c0_22] : memref<1x10xf32, #tpu.memory_space<vmem>>, vector<1x10xf32>
      %33 = arith.addf %31, %32 : vector<1x10xf32>
      %c0_23 = arith.constant 0 : index
      %c0_24 = arith.constant 0 : index
      %c0_25 = arith.constant 0 : index
      %34 = vector.load %arg7[%c0_23, %c0_24, %c0_25] : memref<1x1x10xf32, #tpu.memory_space<vmem>>, vector<1x1x10xf32>
      %35 = vector.shape_cast %34 : vector<1x1x10xf32> to vector<1x10xf32>
      %36 = vector.shape_cast %33 : vector<1x10xf32> to vector<1x1x10xf32>
      tpu.vector_store %arg7[%c0_23, %c0_24, %c0_25], %36 {strides = array<i32>} : memref<1x1x10xf32, #tpu.memory_space<vmem>>, vector<1x1x10xf32>,
    } else {
    }
    return
  }
  func.func @transform_0(%arg0: i32, %arg1: i32) -> (i32, i32, i32) {
    %c0_i32 = arith.constant 0 : i32
    %c0_i32_0 = arith.constant 0 : i32
    return %arg0, %c0_i32, %arg1 : i32, i32, i32
  }
  func.func @transform_1(%arg0: i32, %arg1: i32) -> (i32, i32) {
    %c0_i32 = arith.constant 0 : i32
    %c0_i32_0 = arith.constant 0 : i32
    %c0_i32_1 = arith.constant 0 : i32
    return %c0_i32, %c0_i32_0 : i32, i32
  }
  func.func @transform_2(%arg0: i32, %arg1: i32) -> (i32, i32) {
    %c0_i32 = arith.constant 0 : i32
    %c0_i32_0 = arith.constant 0 : i32
    %c0_i32_1 = arith.constant 0 : i32
    return %c0_i32, %c0_i32_0 : i32, i32
  }
  func.func @transform_3(%arg0: i32, %arg1: i32) -> (i32, i32) {
    %c0_i32 = arith.constant 0 : i32
    %c0_i32_0 = arith.constant 0 : i32
    %c0_i32_1 = arith.constant 0 : i32
    return %c0_i32, %c0_i32_0 : i32, i32
  }
  func.func @transform_4(%arg0: i32, %arg1: i32) -> (i32, i32) {
    %c0_i32 = arith.constant 0 : i32
    %c0_i32_0 = arith.constant 0 : i32
    %c0_i32_1 = arith.constant 0 : i32
    return %c0_i32, %c0_i32_0 : i32, i32
  }
  func.func @transform_5(%arg0: i32, %arg1: i32) -> (i32, i32, i32) {
    %c0_i32 = arith.constant 0 : i32
    %c0_i32_0 = arith.constant 0 : i32
    %c0_i32_1 = arith.constant 0 : i32
    return %arg0, %c0_i32, %c0_i32_0 : i32, i32, i32
  }
}

</mosaic_0001>

<bundles_post_ra>
// kernel: base_model2_forward.1
= control target key start
LH: loop header
LB: loop body
LE: loop exit
PB: predicated region body
PF: predicated region fallthrough
CT: control target
= control target key end

     0   :  { %10 = vsyncpa [#allocation4], 0  ;;  %s915_s0 = inlined_call_operand.vmem [shape: bf16[2,27,64], index: 0, kind: input, shape index: {}]   ;;  %s916_s1 = inlined_call_operand.vmem [shape: bf16[32,27], index: 1, kind: input, shape index: {}]   ;;  %s917_s2 = inlined_call_operand.vmem [shape: f32[32,1], index: 2, kind: input, shape index: {}]   ;;  %s918_s3 = inlined_call_operand.vmem [shape: f32[32,10], index: 3, kind: input, shape index: {}]   ;;  %s919_s4 = inlined_call_operand.vmem [shape: f32[1,10], index: 4, kind: input, shape index: {}]   ;;  %s920_s5 = inlined_call_operand.hbm [shape: f32[2,1,10], index: 5, kind: output, shape index: {}]  }
   0x1   :  { %12 = vsyncpa [#allocation4 + $0x1], 0  ;;  %s768_s18 = smov 0   ;;  %s770_s19 = smov 0  }
   0x2   :  { %s772_s20 = smov 0   ;;  %s774_s21 = smov 0  }
   0x3   :  { %s776_s22 = smov 0   ;;  %s778_s23 = smov 0  }
   0x4 LB: > { %s543_s24 = sadd.s32 4294967295, %s732_s23   ;;  %s544_s25 = sadd.s32 4294967294, %s732_s23   ;;  %s732_s23 = sphi %s778_s23, %s18_s23   ;;  %s728_s22 = sphi %s776_s22, %s927_s22   ;;  %s724_s21 = sphi %s774_s21, %s926_s21   ;;  %s720_s20 = sphi %s772_s20, %s925_s20   ;;  %s716_s19 = sphi %s770_s19, %s924_s19   ;;  %s712_s18 = sphi %s768_s18, %s923_s18  }
   0x5   : > { %s30_s26 = sadd.s32 1, %s728_s22  ;;  %s149_s27 = sadd.s32 1, %s720_s20 }
   0x6   : > { %p32_p0 = scmp.ge.s32.totalorder %s30_s26, 2  ;;  %p159_p1 = scmp.ne.s32.totalorder %s720_s20, %s716_s19 }
   0x7   : > { %p160_p2 = scmp.eq.s32.totalorder %s543_s24, 1  ;;  %p165_p3 = scmp.ne.s32.totalorder %s716_s19, %s712_s18 }
   0x8   : > { %s929_s26 = smov (%p32_p0, %s30_s26), 0  ;;  %p166_p5 = scmp.eq.s32.totalorder %s544_s25, 1 }
   0x9   : > { %p808_p4 = por %p160_p2, %p159_p1  ;;  %s146_s29 = ssub.s32 %s728_s22, %s929_s26 }
   0xa   : > { %p547_p6 = scmp.ge.s32.totalorder %s732_s23, 1  ;;  %p147_p7 = scmp.eq.s32.totalorder %s146_s29, 0 }
   0xb   : > { %p815_p8 = por %p166_p5, %p165_p3  ;;  %p207_p9 = scmp.lt.s32.totalorder %s732_s23, 3 }
   0xc   : > { %s821_s6 = scalar_select %p147_p7, %s720_s20, %s149_s27  }
   0xd   : > { %p208_p10 = pnand %p547_p6, %p207_p9 }
   0xe   : > { %p237_p11 = scmp.lt.s32.totalorder (!%p208_p10), %s724_s21, 1  ;;  %s560_s27 = sshll.u32 (!%p208_p10), %s724_s21, 4 }
   0xf   : > { %211 = sbr.rel (%p208_p10) target bundleno = 458 (0x1ca), region = 40  ;;  %s472_s10 = scalar_lea.hbm (!%p208_p10), %s920_s5, %s560_s27 }
  0x10   : > { %s737_s13 = smov (!%p208_p10), [#allocation3]  }
  0x14   : > { %vm315_vm0 = vcmask 1044480   ;;  %vm316_vm1 = vcmask 1045504   ;;  %v638_v0 = vld [vmem:[%s916_s1] sm:$0xff]   ;;  %vm308_vm2 = vcmask 220160   ;;  %s238_s9 = scalar_select %p237_p11, %s724_s21, 1  ;;  %v734_v1 = vmov 65535  }
  0x15   : > { %v317_v2 = vsel %vm315_vm0, 4294967295, %v734_v1  ;;  %572 = vmatprep.mubr.msk.bf16.mxu0 %vm308_vm2, %v638_v0  ;;  %v263_v3 = vld [vmem:[%s917_s2] sm:$0xff]  ;;  %v265_v4 = vld [vmem:[%s917_s2 + $0x10] sm:$0xff]  ;;  %vm250_vm3 = vcmask 523264   ;;  %v735_v5 = vmov 0   ;;  %v736_v6 = vmov 0.0  }
  0x16   : > { %s563_s14 = sshll.u32 %s238_s9, 4  ;;  %634 = vset.pattern.permute.xlu0 %v735_v5  ;;  %635 = vset.pattern.permute.xlu1 %v735_v5  ;;  %253 = vst.msk [vmem:[#allocation2 + $0x10] sm:$0xff] %vm250_vm3, %v736_v6  ;;  %251 = vst.msk [vmem:[#allocation2] sm:$0xff] %vm250_vm3, %v736_v6  ;;  %v318_v7 = vsel %vm316_vm1, %v317_v2, 0  ;;  %v264_v8 = vld [vmem:[%s917_s2 + $0x8] sm:$0xff]  ;;  %v266_v9 = vld [vmem:[%s917_s2 + $0x18] sm:$0xff] }
  0x17   : > { %252 = vst.msk [vmem:[#allocation2 + $0x8] sm:$0xff] %vm250_vm3, %v736_v6  ;;  %254 = vst.msk [vmem:[#allocation2 + $0x18] sm:$0xff] %vm250_vm3, %v736_v6  ;;  %s244_s17 = scalar_lea.vmem %s915_s0, %s563_s14  ;;  %269 = vperm.xlu0 %634, %v263_v3   ;;  %279 = vperm.xlu1 %635, %v265_v4   ;;  %v639_v13 = vld [vmem:[%s916_s1 + $0x8] sm:$0xff]   ;;  %v435_v0 = vld [vmem:[%s918_s3] sm:$0xff]  ;;  %vm443_vm4 = vcmask 80896   ;;  %vm459_vm5 = vcmask 73728  }
  0x18   : > { %v636_v10 = vld [vmem:[%s244_s17 + $0x8] sm:$0x3f]   ;;  %v637_v12 = vld [vmem:[%s244_s17] sm:$0xff]   ;;  %v437_v3 = vld [vmem:[%s918_s3 + $0x10] sm:$0xff]  ;;  %s235_s17 = sand.u32 1, %s716_s19   ;;  %s660_s14 = sshll.u32 %s737_s13, 4  ;;  %s661_s14 = int_to_ptr.vmem [resolvable:$false] %s660_s14 }
  0x19   : > { %v320_v11 = vand.u32 %v636_v10, %v318_v7  ;;  %v436_v1 = vld [vmem:[%s918_s3 + $0x8] sm:$0xff]  ;;  %v438_v10 = vld [vmem:[%s918_s3 + $0x18] sm:$0xff]  ;;  %s236_s29 = scalar_lea.vmem [#allocation3], %s235_s17  ;;  %s462_s11 = scalar_lea.sflag [#allocation4], %s235_s17 }
  0x1a   : > { %s474_s7 = sshll.u32 %s236_s29, 4  ;;  %s662_s21 = scalar_lea.vmem %s661_s14, 32  ;;  %s475_s7 = int_to_ptr.vmem [resolvable:$true] %s474_s7 }
  0x1b   : > { %274 = vperm.xlu0 %634, %v264_v8   ;;  %284 = vperm.xlu1 %635, %v266_v9   ;;  %s656_s12 = scalar_lea.vmem %s475_s7, 16  ;;  %p663_p1 = scmp.lt.s32.totalorder %s475_s7, %s661_s14 }
  0x1c   : > { %568 = vmatprep.subr.bf16.mxu0 %v320_v11  ;;  %p657_p12 = scmp.ne.s32.totalorder %s475_s7, %s656_s12  ;;  %p664_p2 = scmp.lt.s32.totalorder %s662_s21, %s656_s12 }
  0x1d   : > { %569 = vmatpush3.bf16.msra.mxu0 %v320_v11  ;;  %v401_v39 = vld [vmem:[#allocation2 + $0x10] sm:$0xff]  ;;  %v399_v42 = vld [vmem:[#allocation2] sm:$0xff] }
  0x1e   : > { %570 = vmatprep.subr.bf16.mxu0 %v637_v12  ;;  %v402_v46 = vld [vmem:[#allocation2 + $0x18] sm:$0xff]  ;;  %v400_v50 = vld [vmem:[#allocation2 + $0x8] sm:$0xff]  ;;  %p658_p13 = pnand %p657_p12, %p808_p4  ;;  %p665_p3 = por %p664_p2, %p663_p1 }
  0x20   : > { %p659_p0 = pneg %p658_p13 }
  0x21   : > { %571 = vmatpush3.bf16.msra.mxu0 %v637_v12 }
  0x22   : > { %p666_p5 = pnand %p665_p3, %p659_p0 }
  0x24   : > { %573 = vmatmul.mubr.msk.bf16.vlgmr.msra.gmra.mxu0 %vm308_vm2, %v639_v13 }
  0x92   : > { %v280_v14 = vpop.permute.xlu1 %279  ;;  %v270_v15 = vpop.permute.xlu0 %269 }
  0x96   : > { %v285_v19 = vpop.permute.xlu1 %284  ;;  %v275_v25 = vpop.permute.xlu0 %274 }
  0xe4   : > { %v574_v16 = vpop.f32.mrf.mxu0 }
  0xe5   : > { %v365_v17 = vadd.f32 %v574_v16, %v280_v14 }
  0xe6   : > { %v356_v18 = vpop.f32.mrf.mxu0 }
  0xe7   : > { %v558_v20 = vmul.f32 -1.442695, %v365_v17  ;;  %v357_v21 = vadd.f32 %v356_v18, %v270_v15 }
  0xe8   : > { %v575_v22 = vpop.f32.mrf.mxu0 }
  0xe9   : > { %640 = vpow2.f32 %v558_v20  ;;  %v556_v23 = vmul.f32 -1.442695, %v357_v21  ;;  %v368_v24 = vadd.f32 %v575_v22, %v285_v19 }
  0xea   : > { %v359_v26 = vpop.f32.mrf.mxu0 }
  0xeb   : > { %642 = vpow2.f32 %v556_v23  ;;  %v559_v27 = vmul.f32 -1.442695, %v368_v24  ;;  %v360_v28 = vadd.f32 %v359_v26, %v275_v25  ;;  %v457_v26 = vld [vmem:[%s919_s4] sm:$0x1] }
  0xed   : > { %644 = vpow2.f32 %v559_v27  ;;  %v557_v29 = vmul.f32 -1.442695, %v360_v28 }
  0xef   : > { %646 = vpow2.f32 %v557_v29 }
  0xf6   : > { %v641_v30 = vpop.eup %640 }
  0xf7   : > { %v385_v31 = vadd.f32 1.0, %v641_v30 }
  0xf8   : > { %v643_v32 = vpop.eup %642 }
  0xf9   : > { %648 = vrcp.f32 %v385_v31  ;;  %v383_v33 = vadd.f32 1.0, %v643_v32 }
  0xfa   : > { %v645_v34 = vpop.eup %644 }
  0xfb   : > { %650 = vrcp.f32 %v383_v33  ;;  %v386_v35 = vadd.f32 1.0, %v645_v34 }
  0xfc   : > { %v647_v36 = vpop.eup %646 }
  0xfd   : > { %652 = vrcp.f32 %v386_v35  ;;  %v384_v37 = vadd.f32 1.0, %v647_v36 }
  0xff   : > { %654 = vrcp.f32 %v384_v37 }
 0x106   : > { %v649_v38 = vpop.eup %648 }
 0x107   : > { %v397_v40 = vmul.f32 %v649_v38, %v365_v17 }
 0x108   : > { %v651_v41 = vpop.eup %650 }
 0x109   : > { %v405_v43 = vadd.f32 %v401_v39, %v397_v40  ;;  %v395_v44 = vmul.f32 %v651_v41, %v357_v21 }
 0x10a   : > { %v653_v45 = vpop.eup %652 }
 0x10b   : > { %410 = vst.msk [vmem:[#allocation2 + $0x10] sm:$0xff] %vm250_vm3, %v405_v43  ;;  %v403_v47 = vadd.f32 %v399_v42, %v395_v44  ;;  %v398_v48 = vmul.f32 %v653_v45, %v368_v24 }
 0x10c   : > { %v655_v49 = vpop.eup %654 }
 0x10d   : > { %408 = vst.msk [vmem:[#allocation2] sm:$0xff] %vm250_vm3, %v403_v47  ;;  %v406_v51 = vadd.f32 %v402_v46, %v398_v48  ;;  %v396_v52 = vmul.f32 %v655_v49, %v360_v28 }
 0x10f   : > { %411 = vst.msk [vmem:[#allocation2 + $0x18] sm:$0xff] %vm250_vm3, %v406_v51  ;;  %v404_v53 = vadd.f32 %v400_v50, %v396_v52 }
 0x111   : > { %409 = vst.msk [vmem:[#allocation2 + $0x8] sm:$0xff] %vm250_vm3, %v404_v53 }
 0x112   : > { %v417_v56 = vld [vmem:[#allocation2 + $0x10] sm:$0xff] }
 0x113   : > { %v425_v59 = vsel %vm250_vm3, %v417_v56, 0.0 }
 0x114   : > { %v415_v54 = vld [vmem:[#allocation2] sm:$0xff] }
 0x115   : > { %v419_v55 = vsel %vm250_vm3, %v415_v54, 0.0 }
 0x116   : > { %420 = vadd.xlane.f32.xlu0 %v419_v55  ;;  %v418_v60 = vld [vmem:[#allocation2 + $0x18] sm:$0xff] }
 0x117   : > { %v428_v61 = vsel %vm250_vm3, %v418_v60, 0.0 }
 0x118   : > { %v416_v57 = vld [vmem:[#allocation2 + $0x8] sm:$0xff] }
 0x119   : > { %v422_v58 = vsel %vm250_vm3, %v416_v57, 0.0 }
 0x11a   : > { %423 = vadd.xlane.f32.xlu1 %v422_v58  ;;  %426 = vadd.xlane.f32.xlu0 %v425_v59 }
 0x11e   : > { %429 = vadd.xlane.f32.xlu0 %v428_v61 }
 0x19f   : > { %v421_v62 = vpop.xlane.xlu0 %420 }
 0x1a0   : > { %v431_v63 = vmul.f32 0.015625, %v421_v62 }
 0x1a2   : > { %v439_v5 = vmul.f32 %v435_v0, %v431_v63 }
 0x1a3   : > { %v424_v2 = vpop.xlane.xlu1 %423  ;;  %v427_v4 = vpop.xlane.xlu0 %426 }
 0x1a4   : > { %v432_v6 = vmul.f32 0.015625, %v424_v2  ;;  %v433_v7 = vmul.f32 0.015625, %v427_v4  ;;  %v444_v12 = vsel %vm443_vm4, %v439_v5, 0.0 }
 0x1a6   : > { %v440_v8 = vmul.f32 %v436_v1, %v432_v6  ;;  %v441_v9 = vmul.f32 %v437_v3, %v433_v7 }
 0x1a7   : > { %v430_v11 = vpop.xlane.xlu0 %429 }
 0x1a8   : > { %v445_v13 = vsel %vm443_vm4, %v440_v8, 0.0  ;;  %v434_v14 = vmul.f32 0.015625, %v430_v11  ;;  %v447_v16 = vsel %vm443_vm4, %v441_v9, 0.0 }
 0x1a9   : > { %v446_v15 = vadd.f32 %v445_v13, %v444_v12 }
 0x1aa   : > { %v442_v17 = vmul.f32 %v438_v10, %v434_v14 }
 0x1ab   : > { %v448_v18 = vadd.f32 %v447_v16, %v446_v15 }
 0x1ac   : > { %v449_v19 = vsel %vm443_vm4, %v442_v17, 0.0 }
 0x1ad   : > { %v450_v20 = vadd.f32 %v449_v19, %v448_v18 }
 0x1af   : > { %v451_v21 = vrot.slane %v450_v20, 4 }
 0x1b1   : > { %v452_v22 = vadd.f32 %v451_v21, %v450_v20 }
 0x1b3   : > { %v453_v23 = vrot.slane %v452_v22, 2 }
 0x1b5   : > { %v454_v24 = vadd.f32 %v453_v23, %v452_v22 }
 0x1b7   : > { %v455_v25 = vrot.slane %v454_v24, 1 }
 0x1b9   : > { %v456_v27 = vadd.f32 %v455_v25, %v454_v24 }
 0x1bb   : > { %v458_v28 = vadd.f32 %v457_v26, %v456_v27 }
 0x1bd   : > { %460 = vst.msk [vmem:[%s236_s29] sm:$0x1] %vm459_vm5, %v458_v28 }
 0x1be   : > { %669 = shalt.err (!%p666_p5)
}
 0x1bf   : > { %s670_s15 = scalar_lea.hbm %s472_s10, 16  ;;  %s674_s24 = scalar_lea.hbm %s920_s5, 32 }
 0x1c0   : > { %p671_p6 = scmp.ne.s32.totalorder %s472_s10, %s670_s15  ;;  %p675_p10 = scmp.lt.s32.totalorder %s472_s10, %s920_s5 }
 0x1c1   : > { %p676_p11 = scmp.lt.s32.totalorder %s674_s24, %s670_s15 }
 0x1c2   : > { %p672_p7 = pnand %p671_p6, %p808_p4 }
 0x1c3   : > { %p677_p12 = por %p676_p11, %p675_p10 }
 0x1c4   : > { %p673_p9 = pneg %p672_p7 }
 0x1c6   : > { %p678_p13 = pnand %p677_p12, %p673_p9 }
 0x1c8   : > { %681 = shalt.err (!%p678_p13)
}
 0x1c9   : > { %576 = dma.vmem_to_hbm [thread:$0]  (%p808_p4), %s475_s7, 16, %s472_s10, %s462_s11  }
 0x1ca PF: > { %p582_p0 = scmp.ge.s32.totalorder %s732_s23, 2  ;;  %s486_s29 = sand.u32 1, %s712_s18  }
 0x1cb   : > { %s487_s8 = scalar_lea.sflag [#allocation4], %s486_s29 }
 0x1cc   : > { %p579_p1 = pnand %p582_p0, %p815_p8 }
 0x1ce   : > { %p580_p2 = pneg %p579_p1 }
 0x1d0   : > { %707 = dma.done.wait (%p580_p2), %s487_s8, 16  }
 0x1d1   : > { %709 = vsyncadd (%p580_p2), %s487_s8, 4294967280  ;;  %s18_s23 = sadd.s32 1, %s732_s23   ;;  %s923_s18 = smov %s716_s19 }
 0x1d2   : > { %p15_p3 = scmp.ge.s32.totalorder %s18_s23, 4   ;;  %s924_s19 = smov %s720_s20 }
 0x1d3   : > { %s925_s20 = smov %s821_s6  ;;  %s926_s21 = smov %s728_s22 }
 0x1d4   : > { %s927_s22 = smov %s929_s26  ;;  %17 = sbr.rel (!%p15_p3) target bundleno = 4 (0x4), region = 83 }
 0x1d9   :  { %491 = vsyncpa [#allocation4], 1 }
 0x1da   :  { %493 = vsyncpa [#allocation4 + $0x1], 1 }

</bundles_post_ra>
